<compile_context>
chip_gen: v7x
topology: tpu7x:2x2x1
jax: 0.10.0
libtpu: 0.0.40
codegen_flags: <defaults>
</compile_context>

<pallas_src>
import jax
import jax.numpy as jnp
from jax import lax
from jax.experimental import pallas as pl
from jax.experimental.pallas import tpu as pltpu


# ---------------------------------------------------------------------------
# Constants (cv2 float formulas, divisions pre-folded).
_LAB_THRESH = 0.008856
_LAB_LIN_OFF = 16.0 / 116.0
_INV_CBRT_MAGIC = 0x54B25BE9  # bit-trick seed for t ** (-1/3)

_XR, _XG, _XB = 0.412453 / 0.950456, 0.357580 / 0.950456, 0.180423 / 0.950456
_YR, _YG, _YB = 0.212671, 0.715160, 0.072169
_ZR, _ZG, _ZB = 0.019334 / 1.088754, 0.119193 / 1.088754, 0.950227 / 1.088754
_LR, _LG, _LB = 0.299, 0.587, 0.114  # YUV luma


def _round_up(a, b):
    return (a + b - 1) // b * b


def _cdiv(a, b):
    return -(-a // b)


def _cbrt_poly(t):
    """Cube root via bit-trick seed + 3 Newton steps (VPU-only, for v5-class)."""
    i = pltpu.bitcast(t, jnp.int32)
    third = (i.astype(jnp.float32) * (1.0 / 3.0)).astype(jnp.int32)
    r = pltpu.bitcast(jnp.int32(_INV_CBRT_MAGIC) - third, jnp.float32)
    t_third = t * (1.0 / 3.0)
    for _ in range(3):
        r = r * (4.0 / 3.0 - t_third * (r * r) * r)
    return t * (r * r)


def _default_use_eup():
    """EUP exp/log cbrt on v6e/v7x; VALU polynomial on v5-class chips."""
    try:
        kind = jax.devices()[0].device_kind.lower()
    except Exception:  # pragma: no cover - defensive
        return True
    return "v5" not in kind


# ---------------------------------------------------------------------------
# Kernel factory.
def _make_color_loss_kernel(tile_rows, rows_valid, need_mask, use_eup):
    n_strips = tile_rows // 8

    def lab_f(t):
        # OpenCV LAB helper f(t): cbrt above threshold, linear below.
        tc = jnp.maximum(t, _LAB_THRESH)  # keep log() NaN-free
        if use_eup:
            c = jnp.exp(jnp.log(tc) * (1.0 / 3.0))  # EUP slot (free vs VALU)
        else:
            c = _cbrt_poly(tc)
        return jnp.where(t > _LAB_THRESH, c, 7.787 * t + _LAB_LIN_OFF)

    def kernel(inp_ref, lab_ref, out_ref):
        # inp_ref / lab_ref: (1, 3, tile_rows, 128); out_ref: (1, 1, 8, 128)
        if need_mask:
            limit = rows_valid - pl.program_id(1) * tile_rows
            row_iota = lax.broadcasted_iota(jnp.int32, (8, 128), 0)

        def body(s, acc):
            r0 = pl.multiple_of(s * 8, 8)

            def ch(ref, c):
                return ref[0, c, pl.ds(r0, 8), :].astype(jnp.float32)

            xb, xg, xr = ch(inp_ref, 0), ch(inp_ref, 1), ch(inp_ref, 2)
            yb, yg, yr = ch(lab_ref, 0), ch(lab_ref, 1), ch(lab_ref, 2)

            # LAB: a_i - a_l = 500*(dfX - dfY), b_i - b_l = 200*(dfY - dfZ)
            dfX = lab_f(_XR * xr + _XG * xg + _XB * xb) - lab_f(_XR * yr + _XG * yg + _XB * yb)
            dfY = lab_f(_YR * xr + _YG * xg + _YB * xb) - lab_f(_YR * yr + _YG * yg + _YB * yb)
            dfZ = lab_f(_ZR * xr + _ZG * xg + _ZB * xb) - lab_f(_ZR * yr + _ZG * yg + _ZB * yb)
            s_lab = 500.0 * jnp.abs(dfX - dfY) + 200.0 * jnp.abs(dfY - dfZ)

            # YUV: U_i-U_l = 0.492*(dB - dYl), V_i-V_l = 0.877*(dR - dYl)
            dB, dG, dR = xb - yb, xg - yg, xr - yr
            dYl = _LR * dR + _LG * dG + _LB * dB
            s_uv = 0.492 * jnp.abs(dB - dYl) + 0.877 * jnp.abs(dR - dYl)

            s_all = s_lab + s_uv
            if need_mask:
                s_all = jnp.where(row_iota + r0 < limit, s_all, 0.0)
            return acc + s_all

        acc = lax.fori_loop(0, n_strips, body,
                            jnp.zeros((8, 128), jnp.float32),
                            unroll=min(4, n_strips))
        out_ref[...] = acc.reshape(out_ref.shape)

    return kernel


# ---------------------------------------------------------------------------
# Wrapper.
def color_loss_pallas(inp, lab, *, max_tile_rows=2048, cbrt_impl=None):
    """inp, lab: (N, 3, H, W) float arrays, BGR order, values in [0, 1]."""
    N, C, H, W = inp.shape
    assert C == 3, "color_loss expects 3-channel BGR images"
    assert lab.shape == inp.shape
    hw = H * W

    use_eup = _default_use_eup() if cbrt_impl is None else (cbrt_impl == "eup")

    def prep(a):
        # Pass f32/bf16 straight through (upcast per-strip in-kernel).
        if a.dtype not in (jnp.float32, jnp.bfloat16):
            a = a.astype(jnp.float32)
        return a.reshape(N, 3, hw)

    x, y = prep(inp), prep(lab)

    # Lane-dense layout: (rows, 128), rows aligned to 8 sublanes. Only pad to
    # the aligned slab (no tile-multiple padding); ragged tiles masked in-kernel.
    rows = _cdiv(hw, 128)
    rows_padded = _round_up(rows, 8)
    lane_pad = rows_padded * 128 - hw
    if lane_pad:
        # Identical zero padding on both inputs -> padded pixels contribute 0.
        x = jnp.pad(x, ((0, 0), (0, 0), (0, lane_pad)))
        y = jnp.pad(y, ((0, 0), (0, 0), (0, lane_pad)))
    x = x.reshape(N, 3, rows_padded, 128)
    y = y.reshape(N, 3, rows_padded, 128)

    # Balanced tiling of the row axis.
    num_tiles = _cdiv(rows_padded, max_tile_rows)
    tile_rows = min(_round_up(_cdiv(rows_padded, num_tiles), 8), rows_padded)
    num_tiles = _cdiv(rows_padded, tile_rows)
    need_mask = (num_tiles * tile_rows != rows_padded)

    kernel = _make_color_loss_kernel(tile_rows, rows_padded, need_mask, use_eup)

    partial = pl.pallas_call(
        kernel,
        out_shape=jax.ShapeDtypeStruct((N, num_tiles, 8, 128), jnp.float32),
        grid_spec=pltpu.PrefetchScalarGridSpec(
            num_scalar_prefetch=0,
            grid=(N, num_tiles),
            in_specs=[
                pl.BlockSpec((1, 3, tile_rows, 128), lambda i, j: (i, 0, j, 0)),
                pl.BlockSpec((1, 3, tile_rows, 128), lambda i, j: (i, 0, j, 0)),
            ],
            out_specs=pl.BlockSpec((1, 1, 8, 128), lambda i, j: (i, j, 0, 0)),
        ),
        compiler_params=pltpu.CompilerParams(
            dimension_semantics=("parallel", "parallel"),
            vmem_limit_bytes=32 * 1024 * 1024,
        ),
    )(x, y)

    # Each image's loss is its pixel-sum / (H*W); global scale is 1/(128*N).
    return jnp.sum(partial) / (hw * 128.0 * N)


# ---------------------------------------------------------------------------
# Pure-JAX reference (independent cube root via jnp.cbrt).
def _color_loss_ref(inp, lab):
    def lab_ab(img):  # img: (3, H, W), BGR
        Bc, Gc, Rc = img[0], img[1], img[2]
        X = (0.412453 * Rc + 0.357580 * Gc + 0.180423 * Bc) / 0.950456
        Y = 0.212671 * Rc + 0.715160 * Gc + 0.072169 * Bc
        Z = (0.019334 * Rc + 0.119193 * Gc + 0.950227 * Bc) / 1.088754
        f = lambda t: jnp.where(t > 0.008856, jnp.cbrt(t), 7.787 * t + 16.0 / 116.0)
        fX, fY, fZ = f(X), f(Y), f(Z)
        return 500.0 * (fX - fY), 200.0 * (fY - fZ)

    def yuv_uv(img):
        Bc, Gc, Rc = img[0], img[1], img[2]
        Y = 0.299 * Rc + 0.587 * Gc + 0.114 * Bc
        return 0.492 * (Bc - Y), 0.877 * (Rc - Y)

    total = 0.0
    for i in range(inp.shape[0]):
        xi, yi = inp[i].astype(jnp.float32), lab[i].astype(jnp.float32)
        a_i, b_i = lab_ab(xi)
        a_l, b_l = lab_ab(yi)
        u_i, v_i = yuv_uv(xi)
        u_l, v_l = yuv_uv(yi)
        total = (total
                 + jnp.mean(jnp.abs(a_i - a_l)) + jnp.mean(jnp.abs(b_i - b_l))
                 + jnp.mean(jnp.abs(u_i - u_l)) + jnp.mean(jnp.abs(v_i - v_l)))
    return total / (128.0 * inp.shape[0])


if __name__ == "__main__":
    key = jax.random.PRNGKey(0)
    k1, k2 = jax.random.split(key)
    N, C, H, W = 2, 3, 16, 16
    inp = jax.random.uniform(k1, (N, C, H, W), dtype=jnp.float32)
    lab = jax.random.uniform(k2, (N, C, H, W), dtype=jnp.float32)

    out = jax.block_until_ready(color_loss_pallas(inp, lab))
    ref = jax.block_until_ready(_color_loss_ref(inp, lab))

    assert jnp.isfinite(out), "non-finite loss"
    assert jnp.allclose(out, ref, rtol=2e-4, atol=1e-6), (out, ref)
    print("KERNEL_OK")
</pallas_src>

<mosaic_0001>
module attributes {stable_mosaic.version = 11 : i64} {
  func.func @kernel(%arg0: i32, %arg1: i32, %arg2: memref<1x3x8x128xf32, #tpu.memory_space<vmem>>, %arg3: memref<1x3x8x128xf32, #tpu.memory_space<vmem>>, %arg4: memref<1x1x8x128xf32, #tpu.memory_space<vmem>>) attributes {dimension_semantics = [#tpu.dimension_semantics<parallel>, #tpu.dimension_semantics<parallel>], iteration_bounds = array<i64: 2, 1>, scalar_prefetch = 0 : i64, scratch_operands = 0 : i64, tpu.core_type = #tpu.core_type<tc>, window_params = [{transform_indices = @transform_0, window_bounds = array<i64: 1, 3, 8, 128>}, {transform_indices = @transform_1, window_bounds = array<i64: 1, 3, 8, 128>}, {transform_indices = @transform_2, window_bounds = array<i64: 1, 1, 8, 128>}]} {
    %cst = arith.constant 0.000000e+00 : f32
    %0 = vector.broadcast %cst : f32 to vector<8x128xf32>
    %c0_i32 = arith.constant 0 : i32
    %c8_i32 = arith.constant 8 : i32
    %1 = arith.muli %c0_i32, %c8_i32 : i32
    %2 = tpu.assume_multiple %1, 8 : i32
    %c0 = arith.constant 0 : index
    %c0_0 = arith.constant 0 : index
    %3 = arith.index_cast %2 : i32 to index
    %c0_1 = arith.constant 0 : index
    %4 = vector.load %arg2[%c0, %c0_0, %3, %c0_1] : memref<1x3x8x128xf32, #tpu.memory_space<vmem>>, vector<1x1x8x128xf32>
    %5 = vector.shape_cast %4 : vector<1x1x8x128xf32> to vector<8x128xf32>
    %c0_2 = arith.constant 0 : index
    %c1 = arith.constant 1 : index
    %6 = arith.index_cast %2 : i32 to index
    %c0_3 = arith.constant 0 : index
    %7 = vector.load %arg2[%c0_2, %c1, %6, %c0_3] : memref<1x3x8x128xf32, #tpu.memory_space<vmem>>, vector<1x1x8x128xf32>
    %8 = vector.shape_cast %7 : vector<1x1x8x128xf32> to vector<8x128xf32>
    %c0_4 = arith.constant 0 : index
    %c2 = arith.constant 2 : index
    %9 = arith.index_cast %2 : i32 to index
    %c0_5 = arith.constant 0 : index
    %10 = vector.load %arg2[%c0_4, %c2, %9, %c0_5] : memref<1x3x8x128xf32, #tpu.memory_space<vmem>>, vector<1x1x8x128xf32>
    %11 = vector.shape_cast %10 : vector<1x1x8x128xf32> to vector<8x128xf32>
    %c0_6 = arith.constant 0 : index
    %c0_7 = arith.constant 0 : index
    %12 = arith.index_cast %2 : i32 to index
    %c0_8 = arith.constant 0 : index
    %13 = vector.load %arg3[%c0_6, %c0_7, %12, %c0_8] : memref<1x3x8x128xf32, #tpu.memory_space<vmem>>, vector<1x1x8x128xf32>
    %14 = vector.shape_cast %13 : vector<1x1x8x128xf32> to vector<8x128xf32>
    %c0_9 = arith.constant 0 : index
    %c1_10 = arith.constant 1 : index
    %15 = arith.index_cast %2 : i32 to index
    %c0_11 = arith.constant 0 : index
    %16 = vector.load %arg3[%c0_9, %c1_10, %15, %c0_11] : memref<1x3x8x128xf32, #tpu.memory_space<vmem>>, vector<1x1x8x128xf32>
    %17 = vector.shape_cast %16 : vector<1x1x8x128xf32> to vector<8x128xf32>
    %c0_12 = arith.constant 0 : index
    %c2_13 = arith.constant 2 : index
    %18 = arith.index_cast %2 : i32 to index
    %c0_14 = arith.constant 0 : index
    %19 = vector.load %arg3[%c0_12, %c2_13, %18, %c0_14] : memref<1x3x8x128xf32, #tpu.memory_space<vmem>>, vector<1x1x8x128xf32>
    %20 = vector.shape_cast %19 : vector<1x1x8x128xf32> to vector<8x128xf32>
    %cst_15 = arith.constant 0.433952749 : f32
    %21 = vector.broadcast %cst_15 : f32 to vector<8x128xf32>
    %22 = arith.mulf %21, %11 : vector<8x128xf32>
    %cst_16 = arith.constant 0.376219422 : f32
    %23 = vector.broadcast %cst_16 : f32 to vector<8x128xf32>
    %24 = arith.mulf %23, %8 : vector<8x128xf32>
    %25 = arith.addf %22, %24 : vector<8x128xf32>
    %cst_17 = arith.constant 0.18982783 : f32
    %26 = vector.broadcast %cst_17 : f32 to vector<8x128xf32>
    %27 = arith.mulf %26, %5 : vector<8x128xf32>
    %28 = arith.addf %25, %27 : vector<8x128xf32>
    %cst_18 = arith.constant 8.856000e-03 : f32
    %29 = vector.broadcast %cst_18 : f32 to vector<8x128xf32>
    %30 = arith.maximumf %28, %29 : vector<8x128xf32>
    %31 = math.log %30 : vector<8x128xf32>
    %cst_19 = arith.constant 0.333333343 : f32
    %32 = vector.broadcast %cst_19 : f32 to vector<8x128xf32>
    %33 = arith.mulf %31, %32 : vector<8x128xf32>
    %34 = math.exp %33 : vector<8x128xf32>
    %cst_20 = arith.constant 8.856000e-03 : f32
    %35 = vector.broadcast %cst_20 : f32 to vector<8x128xf32>
    %36 = arith.cmpf ogt, %28, %35 : vector<8x128xf32>
    %cst_21 = arith.constant 7.787000e+00 : f32
    %37 = vector.broadcast %cst_21 : f32 to vector<8x128xf32>
    %38 = arith.mulf %37, %28 : vector<8x128xf32>
    %cst_22 = arith.constant 0.137931034 : f32
    %39 = vector.broadcast %cst_22 : f32 to vector<8x128xf32>
    %40 = arith.addf %38, %39 : vector<8x128xf32>
    %41 = arith.select %36, %34, %40 : vector<8x128xi1>, vector<8x128xf32>
    %cst_23 = arith.constant 0.433952749 : f32
    %42 = vector.broadcast %cst_23 : f32 to vector<8x128xf32>
    %43 = arith.mulf %42, %20 : vector<8x128xf32>
    %cst_24 = arith.constant 0.376219422 : f32
    %44 = vector.broadcast %cst_24 : f32 to vector<8x128xf32>
    %45 = arith.mulf %44, %17 : vector<8x128xf32>
    %46 = arith.addf %43, %45 : vector<8x128xf32>
    %cst_25 = arith.constant 0.18982783 : f32
    %47 = vector.broadcast %cst_25 : f32 to vector<8x128xf32>
    %48 = arith.mulf %47, %14 : vector<8x128xf32>
    %49 = arith.addf %46, %48 : vector<8x128xf32>
    %cst_26 = arith.constant 8.856000e-03 : f32
    %50 = vector.broadcast %cst_26 : f32 to vector<8x128xf32>
    %51 = arith.maximumf %49, %50 : vector<8x128xf32>
    %52 = math.log %51 : vector<8x128xf32>
    %cst_27 = arith.constant 0.333333343 : f32
    %53 = vector.broadcast %cst_27 : f32 to vector<8x128xf32>
    %54 = arith.mulf %52, %53 : vector<8x128xf32>
    %55 = math.exp %54 : vector<8x128xf32>
    %cst_28 = arith.constant 8.856000e-03 : f32
    %56 = vector.broadcast %cst_28 : f32 to vector<8x128xf32>
    %57 = arith.cmpf ogt, %49, %56 : vector<8x128xf32>
    %cst_29 = arith.constant 7.787000e+00 : f32
    %58 = vector.broadcast %cst_29 : f32 to vector<8x128xf32>
    %59 = arith.mulf %58, %49 : vector<8x128xf32>
    %cst_30 = arith.constant 0.137931034 : f32
    %60 = vector.broadcast %cst_30 : f32 to vector<8x128xf32>
    %61 = arith.addf %59, %60 : vector<8x128xf32>
    %62 = arith.select %57, %55, %61 : vector<8x128xi1>, vector<8x128xf32>
    %63 = arith.subf %41, %62 : vector<8x128xf32>
    %cst_31 = arith.constant 2.126710e-01 : f32
    %64 = vector.broadcast %cst_31 : f32 to vector<8x128xf32>
    %65 = arith.mulf %64, %11 : vector<8x128xf32>
    %cst_32 = arith.constant 7.151600e-01 : f32
    %66 = vector.broadcast %cst_32 : f32 to vector<8x128xf32>
    %67 = arith.mulf %66, %8 : vector<8x128xf32>
    %68 = arith.addf %65, %67 : vector<8x128xf32>
    %cst_33 = arith.constant 7.216900e-02 : f32
    %69 = vector.broadcast %cst_33 : f32 to vector<8x128xf32>
    %70 = arith.mulf %69, %5 : vector<8x128xf32>
    %71 = arith.addf %68, %70 : vector<8x128xf32>
    %cst_34 = arith.constant 8.856000e-03 : f32
    %72 = vector.broadcast %cst_34 : f32 to vector<8x128xf32>
    %73 = arith.maximumf %71, %72 : vector<8x128xf32>
    %74 = math.log %73 : vector<8x128xf32>
    %cst_35 = arith.constant 0.333333343 : f32
    %75 = vector.broadcast %cst_35 : f32 to vector<8x128xf32>
    %76 = arith.mulf %74, %75 : vector<8x128xf32>
    %77 = math.exp %76 : vector<8x128xf32>
    %cst_36 = arith.constant 8.856000e-03 : f32
    %78 = vector.broadcast %cst_36 : f32 to vector<8x128xf32>
    %79 = arith.cmpf ogt, %71, %78 : vector<8x128xf32>
    %cst_37 = arith.constant 7.787000e+00 : f32
    %80 = vector.broadcast %cst_37 : f32 to vector<8x128xf32>
    %81 = arith.mulf %80, %71 : vector<8x128xf32>
    %cst_38 = arith.constant 0.137931034 : f32
    %82 = vector.broadcast %cst_38 : f32 to vector<8x128xf32>
    %83 = arith.addf %81, %82 : vector<8x128xf32>
    %84 = arith.select %79, %77, %83 : vector<8x128xi1>, vector<8x128xf32>
    %cst_39 = arith.constant 2.126710e-01 : f32
    %85 = vector.broadcast %cst_39 : f32 to vector<8x128xf32>
    %86 = arith.mulf %85, %20 : vector<8x128xf32>
    %cst_40 = arith.constant 7.151600e-01 : f32
    %87 = vector.broadcast %cst_40 : f32 to vector<8x128xf32>
    %88 = arith.mulf %87, %17 : vector<8x128xf32>
    %89 = arith.addf %86, %88 : vector<8x128xf32>
    %cst_41 = arith.constant 7.216900e-02 : f32
    %90 = vector.broadcast %cst_41 : f32 to vector<8x128xf32>
    %91 = arith.mulf %90, %14 : vector<8x128xf32>
    %92 = arith.addf %89, %91 : vector<8x128xf32>
    %cst_42 = arith.constant 8.856000e-03 : f32
    %93 = vector.broadcast %cst_42 : f32 to vector<8x128xf32>
    %94 = arith.maximumf %92, %93 : vector<8x128xf32>
    %95 = math.log %94 : vector<8x128xf32>
    %cst_43 = arith.constant 0.333333343 : f32
    %96 = vector.broadcast %cst_43 : f32 to vector<8x128xf32>
    %97 = arith.mulf %95, %96 : vector<8x128xf32>
    %98 = math.exp %97 : vector<8x128xf32>
    %cst_44 = arith.constant 8.856000e-03 : f32
    %99 = vector.broadcast %cst_44 : f32 to vector<8x128xf32>
    %100 = arith.cmpf ogt, %92, %99 : vector<8x128xf32>
    %cst_45 = arith.constant 7.787000e+00 : f32
    %101 = vector.broadcast %cst_45 : f32 to vector<8x128xf32>
    %102 = arith.mulf %101, %92 : vector<8x128xf32>
    %cst_46 = arith.constant 0.137931034 : f32
    %103 = vector.broadcast %cst_46 : f32 to vector<8x128xf32>
    %104 = arith.addf %102, %103 : vector<8x128xf32>
    %105 = arith.select %100, %98, %104 : vector<8x128xi1>, vector<8x128xf32>
    %106 = arith.subf %84, %105 : vector<8x128xf32>
    %cst_47 = arith.constant 0.017757915 : f32
    %107 = vector.broadcast %cst_47 : f32 to vector<8x128xf32>
    %108 = arith.mulf %107, %11 : vector<8x128xf32>
    %cst_48 = arith.constant 0.109476522 : f32
    %109 = vector.broadcast %cst_48 : f32 to vector<8x128xf32>
    %110 = arith.mulf %109, %8 : vector<8x128xf32>
    %111 = arith.addf %108, %110 : vector<8x128xf32>
    %cst_49 = arith.constant 0.872765541 : f32
    %112 = vector.broadcast %cst_49 : f32 to vector<8x128xf32>
    %113 = arith.mulf %112, %5 : vector<8x128xf32>
    %114 = arith.addf %111, %113 : vector<8x128xf32>
    %cst_50 = arith.constant 8.856000e-03 : f32
    %115 = vector.broadcast %cst_50 : f32 to vector<8x128xf32>
    %116 = arith.maximumf %114, %115 : vector<8x128xf32>
    %117 = math.log %116 : vector<8x128xf32>
    %cst_51 = arith.constant 0.333333343 : f32
    %118 = vector.broadcast %cst_51 : f32 to vector<8x128xf32>
    %119 = arith.mulf %117, %118 : vector<8x128xf32>
    %120 = math.exp %119 : vector<8x128xf32>
    %cst_52 = arith.constant 8.856000e-03 : f32
    %121 = vector.broadcast %cst_52 : f32 to vector<8x128xf32>
    %122 = arith.cmpf ogt, %114, %121 : vector<8x128xf32>
    %cst_53 = arith.constant 7.787000e+00 : f32
    %123 = vector.broadcast %cst_53 : f32 to vector<8x128xf32>
    %124 = arith.mulf %123, %114 : vector<8x128xf32>
    %cst_54 = arith.constant 0.137931034 : f32
    %125 = vector.broadcast %cst_54 : f32 to vector<8x128xf32>
    %126 = arith.addf %124, %125 : vector<8x128xf32>
    %127 = arith.select %122, %120, %126 : vector<8x128xi1>, vector<8x128xf32>
    %cst_55 = arith.constant 0.017757915 : f32
    %128 = vector.broadcast %cst_55 : f32 to vector<8x128xf32>
    %129 = arith.mulf %128, %20 : vector<8x128xf32>
    %cst_56 = arith.constant 0.109476522 : f32
    %130 = vector.broadcast %cst_56 : f32 to vector<8x128xf32>
    %131 = arith.mulf %130, %17 : vector<8x128xf32>
    %132 = arith.addf %129, %131 : vector<8x128xf32>
    %cst_57 = arith.constant 0.872765541 : f32
    %133 = vector.broadcast %cst_57 : f32 to vector<8x128xf32>
    %134 = arith.mulf %133, %14 : vector<8x128xf32>
    %135 = arith.addf %132, %134 : vector<8x128xf32>
    %cst_58 = arith.constant 8.856000e-03 : f32
    %136 = vector.broadcast %cst_58 : f32 to vector<8x128xf32>
    %137 = arith.maximumf %135, %136 : vector<8x128xf32>
    %138 = math.log %137 : vector<8x128xf32>
    %cst_59 = arith.constant 0.333333343 : f32
    %139 = vector.broadcast %cst_59 : f32 to vector<8x128xf32>
    %140 = arith.mulf %138, %139 : vector<8x128xf32>
    %141 = math.exp %140 : vector<8x128xf32>
    %cst_60 = arith.constant 8.856000e-03 : f32
    %142 = vector.broadcast %cst_60 : f32 to vector<8x128xf32>
    %143 = arith.cmpf ogt, %135, %142 : vector<8x128xf32>
    %cst_61 = arith.constant 7.787000e+00 : f32
    %144 = vector.broadcast %cst_61 : f32 to vector<8x128xf32>
    %145 = arith.mulf %144, %135 : vector<8x128xf32>
    %cst_62 = arith.constant 0.137931034 : f32
    %146 = vector.broadcast %cst_62 : f32 to vector<8x128xf32>
    %147 = arith.addf %145, %146 : vector<8x128xf32>
    %148 = arith.select %143, %141, %147 : vector<8x128xi1>, vector<8x128xf32>
    %149 = arith.subf %127, %148 : vector<8x128xf32>
    %150 = arith.subf %63, %106 : vector<8x128xf32>
    %151 = math.absf %150 : vector<8x128xf32>
    %cst_63 = arith.constant 5.000000e+02 : f32
    %152 = vector.broadcast %cst_63 : f32 to vector<8x128xf32>
    %153 = arith.mulf %152, %151 : vector<8x128xf32>
    %154 = arith.subf %106, %149 : vector<8x128xf32>
    %155 = math.absf %154 : vector<8x128xf32>
    %cst_64 = arith.constant 2.000000e+02 : f32
    %156 = vector.broadcast %cst_64 : f32 to vector<8x128xf32>
    %157 = arith.mulf %156, %155 : vector<8x128xf32>
    %158 = arith.addf %153, %157 : vector<8x128xf32>
    %159 = arith.subf %5, %14 : vector<8x128xf32>
    %160 = arith.subf %8, %17 : vector<8x128xf32>
    %161 = arith.subf %11, %20 : vector<8x128xf32>
    %cst_65 = arith.constant 2.990000e-01 : f32
    %162 = vector.broadcast %cst_65 : f32 to vector<8x128xf32>
    %163 = arith.mulf %162, %161 : vector<8x128xf32>
    %cst_66 = arith.constant 5.870000e-01 : f32
    %164 = vector.broadcast %cst_66 : f32 to vector<8x128xf32>
    %165 = arith.mulf %164, %160 : vector<8x128xf32>
    %166 = arith.addf %163, %165 : vector<8x128xf32>
    %cst_67 = arith.constant 1.140000e-01 : f32
    %167 = vector.broadcast %cst_67 : f32 to vector<8x128xf32>
    %168 = arith.mulf %167, %159 : vector<8x128xf32>
    %169 = arith.addf %166, %168 : vector<8x128xf32>
    %170 = arith.subf %159, %169 : vector<8x128xf32>
    %171 = math.absf %170 : vector<8x128xf32>
    %cst_68 = arith.constant 4.920000e-01 : f32
    %172 = vector.broadcast %cst_68 : f32 to vector<8x128xf32>
    %173 = arith.mulf %172, %171 : vector<8x128xf32>
    %174 = arith.subf %161, %169 : vector<8x128xf32>
    %175 = math.absf %174 : vector<8x128xf32>
    %cst_69 = arith.constant 0.876999974 : f32
    %176 = vector.broadcast %cst_69 : f32 to vector<8x128xf32>
    %177 = arith.mulf %176, %175 : vector<8x128xf32>
    %178 = arith.addf %173, %177 : vector<8x128xf32>
    %179 = arith.addf %158, %178 : vector<8x128xf32>
    %180 = arith.addf %0, %179 : vector<8x128xf32>
    %c1_i32 = arith.constant 1 : i32
    %181 = vector.shape_cast %180 : vector<8x128xf32> to vector<1x1x8x128xf32>
    %c0_70 = arith.constant 0 : index
    %c0_71 = arith.constant 0 : index
    %c0_72 = arith.constant 0 : index
    %c0_73 = arith.constant 0 : index
    %182 = vector.load %arg4[%c0_70, %c0_71, %c0_72, %c0_73] : memref<1x1x8x128xf32, #tpu.memory_space<vmem>>, vector<1x1x8x128xf32>
    tpu.vector_store %arg4[%c0_70, %c0_71, %c0_72, %c0_73], %181 {strides = array<i32>} : memref<1x1x8x128xf32, #tpu.memory_space<vmem>>, vector<1x1x8x128xf32>,
    return
  }
  func.func @transform_0(%arg0: i32, %arg1: i32) -> (i32, i32, i32, i32) {
    %c0_i32 = arith.constant 0 : i32
    %c0_i32_0 = arith.constant 0 : i32
    %c0_i32_1 = arith.constant 0 : i32
    return %arg0, %c0_i32, %arg1, %c0_i32_0 : i32, i32, i32, i32
  }
  func.func @transform_1(%arg0: i32, %arg1: i32) -> (i32, i32, i32, i32) {
    %c0_i32 = arith.constant 0 : i32
    %c0_i32_0 = arith.constant 0 : i32
    %c0_i32_1 = arith.constant 0 : i32
    return %arg0, %c0_i32, %arg1, %c0_i32_0 : i32, i32, i32, i32
  }
  func.func @transform_2(%arg0: i32, %arg1: i32) -> (i32, i32, i32, i32) {
    %c0_i32 = arith.constant 0 : i32
    %c0_i32_0 = arith.constant 0 : i32
    %c0_i32_1 = arith.constant 0 : i32
    return %arg0, %arg1, %c0_i32, %c0_i32_0 : i32, i32, i32, i32
  }
}

</mosaic_0001>

<bundles_post_ra>
// kernel: tpu_custom_call.1
= control target key start
LH: loop header
LB: loop body
LE: loop exit
PB: predicated region body
PF: predicated region fallthrough
CT: control target
= control target key end

     0   :  { %7 = vsyncpa [#allocation3], 0  ;;  %s1048_s0 = inlined_call_operand.hbm [shape: f32[2,3,8,128], index: 0, kind: input, shape index: {}]   ;;  %s1049_s1 = inlined_call_operand.hbm [shape: f32[2,3,8,128], index: 1, kind: input, shape index: {}]   ;;  %s1050_s2 = inlined_call_operand.hbm [shape: f32[2,1,8,128], index: 2, kind: output, shape index: {}]  }
   0x1   :  { %9 = vsyncpa [#allocation3 + $0x1], 0 }
   0x2   :  { %10 = vsyncpa [#allocation6], 0 }
   0x3   :  { %12 = vsyncpa [#allocation6 + $0x1], 0 }
   0x4   :  { %13 = vsyncpa [#allocation4], 0 }
   0x5   :  { %15 = vsyncpa [#allocation4 + $0x1], 0  ;;  %s759_s9 = smov 0   ;;  %s761_s10 = smov 0  }
   0x6   :  { %s763_s11 = smov 0   ;;  %s765_s12 = smov 0  }
   0x7   :  { %s767_s13 = smov 0   ;;  %s769_s14 = smov 0  }
   0x8 LB: > { %s477_s15 = sadd.s32 4294967295, %s737_s14   ;;  %s478_s16 = sadd.s32 4294967294, %s737_s14   ;;  %s737_s14 = sphi %s769_s14, %s21_s14   ;;  %s733_s13 = sphi %s767_s13, %s1068_s13   ;;  %s729_s12 = sphi %s765_s12, %s1067_s12   ;;  %s725_s11 = sphi %s763_s11, %s1066_s11   ;;  %s721_s10 = sphi %s761_s10, %s1065_s10   ;;  %s717_s9 = sphi %s759_s9, %s1064_s9  }
   0x9   : > { %s33_s17 = sadd.s32 1, %s733_s13  ;;  %s42_s18 = sadd.s32 1, %s725_s11 }
   0xa   : > { %p35_p0 = scmp.ge.s32.totalorder %s33_s17, 2  ;;  %p49_p1 = scmp.ne.s32.totalorder %s725_s11, %s721_s10 }
   0xb   : > { %p50_p2 = scmp.eq.s32.totalorder %s737_s14, 0  ;;  %p55_p3 = scmp.ne.s32.totalorder %s721_s10, %s717_s9 }
   0xc   : > { %s1070_s17 = smov (%p35_p0, %s33_s17), 0  ;;  %p56_p5 = scmp.eq.s32.totalorder %s477_s15, 0 }
   0xd   : > { %p800_p4 = por %p50_p2, %p49_p1  ;;  %s37_s20 = ssub.s32 %s733_s13, %s1070_s17 }
   0xe   : > { %p109_p6 = scmp.eq.s32.totalorder %s477_s15, 1  ;;  %p40_p7 = scmp.eq.s32.totalorder %s37_s20, 0 }
   0xf   : > { %p806_p8 = por %p56_p5, %p55_p3  ;;  %p115_p10 = scmp.eq.s32.totalorder %s478_s16, 1 }
  0x10   : > { %p810_p9 = por %p109_p6, %p49_p1  ;;  %p515_p13 = scmp.lt.s32.totalorder %s737_s14, 2 }
  0x11   : > { %s1054_s21 = scalar_select %p806_p8, 1, 0 }
  0x12   : > { %s1055_s22 = scalar_select %p810_p9, 1, 0 }
  0x13   : > { %s815_s23 = scalar_select %p40_p7, %s725_s11, %s42_s18  }
  0x14   : > { %p817_p11 = por %p115_p10, %p55_p3  ;;  %s824_s25 = sand.u32 1, %s725_s11  }
  0x15   : > { %s493_s26 = smul.u32 24, %s824_s25  ;;  %p830_p0 = pnand %p515_p13, %p800_p4 }
  0x16   : > { %s1056_s24 = scalar_select %p817_p11, 1, 0 }
  0x17   : > { %s494_s27 = smul.u32 384, %s733_s13  ;;  %s139_s4 = scalar_lea.vmem [#allocation2], %s493_s26 }
  0x18   : > { %s147_s5 = sshll.u32 %s139_s4, 4  ;;  %s136_s6 = scalar_lea.sflag [#allocation3], %s824_s25  ;;  %s843_s5 = int_to_ptr.vmem [resolvable:$true] %s147_s5 }
  0x19   : > { %s839_s3 = scalar_lea.hbm %s1048_s0, %s494_s27  ;;  %p593_p3 = pneg %p830_p0 }
  0x1a   : > { %s591_s7 = scalar_lea.hbm %s839_s3, 384  ;;  %s596_s16 = scalar_lea.hbm %s1048_s0, 768 }
  0x1b   : > { %p592_p2 = scmp.ne.s32.totalorder %s839_s3, %s591_s7  ;;  %p597_p6 = scmp.lt.u32.totalorder %s839_s3, %s1048_s0 }
  0x1c   : > { %p598_p7 = scmp.lt.u32.totalorder %s596_s16, %s591_s7  ;;  %p600_p13 = scmp.lt.u32.totalorder %s591_s7, %s839_s3 }
  0x1d   : > { %p594_p4 = pnand %p593_p3, %p592_p2 }
  0x1e   : > { %p599_p10 = por %p598_p7, %p597_p6 }
  0x1f   : > { %p595_p5 = pneg %p594_p4 }
  0x20   : > { %p601_p12 = por %p600_p13, %p599_p10 }
  0x22   : > { %p602_p1 = pnand %p601_p12, %p595_p5 }
  0x24   : > { %605 = shalt.err (!%p602_p1)
}
  0x25   : > { %s606_s20 = scalar_lea.vmem %s843_s5, 384  ;;  %s739_s29 = smov [#allocation2]  }
  0x26   : > { %p607_p2 = scmp.ne.s32.totalorder %s843_s5, %s606_s20  ;;  %s611_s30 = sshll.u32 %s739_s29, 4  ;;  %s612_s30 = int_to_ptr.vmem [resolvable:$false] %s611_s30 }
  0x27   : > { %s613_s4 = scalar_lea.vmem %s612_s30, 768  ;;  %p614_p9 = scmp.lt.s32.totalorder %s843_s5, %s612_s30 }
  0x28   : > { %p609_p4 = pnand %p607_p2, %p593_p3  ;;  %p615_p6 = scmp.lt.s32.totalorder %s613_s4, %s606_s20 }
  0x2a   : > { %p610_p11 = pneg %p609_p4  ;;  %p616_p7 = por %p615_p6, %p614_p9 }
  0x2c   : > { %p617_p10 = pnand %p616_p7, %p610_p11 }
  0x2e   : > { %620 = shalt.err (!%p617_p10)
}
  0x2f   : > { %s740_s7 = smov 128   ;;  %s741_s8 = smov 8  }
  0x30   : > { %507 = dma.hbm_to_vmem [thread:$0]  (!%p830_p0), %s839_s3, 384, %s843_s5, %s136_s6, %s740_s7, %s740_s7, %s741_s8  }
  0x31   : > { %p177_p9 = scmp.lt.s32.totalorder %s737_s14, 3  ;;  %s883_s18 = scalar_lea.hbm %s1049_s1, %s494_s27 }
  0x32   : > { %p1058_p11 = scmp.ge.s32.totalorder %s737_s14, 1  ;;  %s161_s20 = scalar_lea.vmem [#allocation5], %s493_s26 }
  0x33   : > { %s169_s29 = sshll.u32 %s161_s20, 4  ;;  %s158_s3 = scalar_lea.sflag [#allocation6], %s824_s25  ;;  %s893_s29 = int_to_ptr.vmem [resolvable:$true] %s169_s29 }
  0x34   : > { %p887_p12 = pnand %p1058_p11, %p177_p9  ;;  %s621_s5 = scalar_lea.hbm %s883_s18, 384 }
  0x35   : > { %p622_p1 = scmp.ne.s32.totalorder %s883_s18, %s621_s5  ;;  %s626_s30 = scalar_lea.hbm %s1049_s1, 768 }
  0x36   : > { %p627_p2 = scmp.lt.u32.totalorder %s883_s18, %s1049_s1  ;;  %p628_p4 = scmp.lt.u32.totalorder %s626_s30, %s621_s5 }
  0x37   : > { %p624_p5 = pnand %p622_p1, %p593_p3  ;;  %p630_p7 = scmp.lt.u32.totalorder %s621_s5, %s883_s18 }
  0x38   : > { %p629_p6 = por %p628_p4, %p627_p2 }
  0x39   : > { %p625_p13 = pneg %p624_p5 }
  0x3a   : > { %p631_p10 = por %p630_p7, %p629_p6 }
  0x3c   : > { %p632_p9 = pnand %p631_p10, %p625_p13 }
  0x3e   : > { %635 = shalt.err (!%p632_p9)
}
  0x3f   : > { %s636_s26 = scalar_lea.vmem %s893_s29, 384  ;;  %s742_s16 = smov [#allocation5]  }
  0x40   : > { %p637_p11 = scmp.ne.s32.totalorder %s893_s29, %s636_s26  ;;  %s641_s20 = sshll.u32 %s742_s16, 4  ;;  %s642_s20 = int_to_ptr.vmem [resolvable:$false] %s641_s20 }
  0x41   : > { %s643_s27 = scalar_lea.vmem %s642_s20, 768  ;;  %p644_p8 = scmp.lt.s32.totalorder %s893_s29, %s642_s20 }
  0x42   : > { %p639_p1 = pnand %p637_p11, %p593_p3  ;;  %p645_p2 = scmp.lt.s32.totalorder %s643_s27, %s636_s26 }
  0x44   : > { %p640_p5 = pneg %p639_p1  ;;  %p646_p4 = por %p645_p2, %p644_p8 }
  0x46   : > { %p647_p6 = pnand %p646_p4, %p640_p5 }
  0x48   : > { %650 = shalt.err (!%p647_p6)
}
  0x49   : > { %510 = dma.hbm_to_vmem [thread:$0]  (!%p830_p0), %s883_s18, 384, %s893_s29, %s158_s3, %s740_s7, %s740_s7, %s741_s8  }
  0x4a   : > { %181 = sbr.rel (%p887_p12) target bundleno = 154 (0x9a), region = 28  ;;  %s927_s5 = sand.u32 (!%p887_p12), 1, %s721_s10  }
  0x4b   : > { %s497_s6 = smul.u32 (!%p887_p12), 24, %s927_s5  ;;  %s184_s30 = scalar_lea.sflag (!%p887_p12), [#allocation3], %s927_s5 }
  0x4c   : > { %p1060_p8 = scmp.ne.s32.totalorder (!%p887_p12), %s1054_s21, 0 }
  0x4d   : > { %s187_s28 = scalar_lea.vmem (!%p887_p12), [#allocation2], %s497_s6 }
  0x51   : > { %704 = dma.done.wait (%p1060_p8), %s184_s30, 384  }
  0x52   : > { %706 = vsyncadd (%p1060_p8), %s184_s30, 4294966912  ;;  %s193_s25 = scalar_lea.sflag [#allocation6], %s927_s5  ;;  %s196_s7 = scalar_lea.vmem [#allocation5], %s497_s6 }
  0x53   : > { %708 = dma.done.wait (%p1060_p8), %s193_s25, 384  }
  0x54   : > { %710 = vsyncadd (%p1060_p8), %s193_s25, 4294966912  ;;  %v940_v0 = vld [vmem:[%s187_s28] sm:$0xff]  ;;  %v942_v1 = vld [vmem:[%s187_s28 + $0x8] sm:$0xff]  ;;  %s484_s21 = sshll.u32 %s927_s5, 3  ;;  %s490_s19 = sshll.u32 %s729_s12, 7 }
  0x55   : > { %v486_v2 = vld [vmem:[%s187_s28 + $0x10] sm:$0xff]  ;;  %v946_v4 = vld [vmem:[%s196_s7 + $0x8] sm:$0xff]  ;;  %v488_v5 = vld [vmem:[%s196_s7 + $0x10] sm:$0xff]  ;;  %v235_v7 = vmul.f32 0.37621942, %v942_v1  ;;  %s221_s8 = scalar_lea.vmem [#allocation7], %s484_s21  ;;  %s1001_s4 = scalar_lea.hbm %s1050_s2, %s490_s19 }
  0x56   : > { %v944_v3 = vld [vmem:[%s196_s7] sm:$0xff]  ;;  %v234_v6 = vmul.f32 0.43395275, %v486_v2  ;;  %v237_v8 = vmul.f32 0.18982783, %v940_v0  ;;  %v335_v56 = vsub.f32 %v942_v1, %v946_v4  ;;  %v336_v57 = vsub.f32 %v486_v2, %v488_v5  ;;  %s367_s18 = sshll.u32 %s221_s8, 4  ;;  %s996_s18 = int_to_ptr.vmem [resolvable:$true] %s367_s18 }
  0x57   : > { %v249_v9 = vmul.f32 0.43395275, %v488_v5  ;;  %v250_v10 = vmul.f32 0.37621942, %v946_v4  ;;  %v252_v11 = vmul.f32 0.18982783, %v944_v3 }
  0x58   : > { %v265_v12 = vmul.f32 0.212671, %v486_v2  ;;  %v236_v13 = vadd.f32 %v235_v7, %v234_v6  ;;  %v266_v14 = vmul.f32 0.71516, %v942_v1  ;;  %v268_v15 = vmul.f32 0.072169, %v940_v0 }
  0x59   : > { %v280_v16 = vmul.f32 0.212671, %v488_v5  ;;  %v251_v17 = vadd.f32 %v250_v10, %v249_v9  ;;  %v281_v18 = vmul.f32 0.71516, %v946_v4  ;;  %v283_v19 = vmul.f32 0.072169, %v944_v3 }
  0x5a   : > { %v956_v20 = vadd.f32 %v237_v8, %v236_v13  ;;  %v267_v21 = vadd.f32 %v266_v14, %v265_v12  ;;  %v296_v26 = vmul.f32 0.017757915, %v486_v2  ;;  %v297_v27 = vmul.f32 0.10947652, %v942_v1  ;;  %s353_s15 = scalar_lea.sflag [#allocation4], %s927_s5  ;;  %s651_s26 = scalar_lea.vmem %s996_s18, 128 }
  0x5b   : > { %v958_v22 = vadd.f32 %v252_v11, %v251_v17  ;;  %v282_v23 = vadd.f32 %v281_v18, %v280_v16  ;;  %v311_v30 = vmul.f32 0.017757915, %v488_v5  ;;  %v312_v31 = vmul.f32 0.10947652, %v946_v4  ;;  %p652_p0 = scmp.ne.s32.totalorder %s996_s18, %s651_s26  ;;  %p1061_p3 = scmp.ne.s32.totalorder %s1055_s22, 0 }
  0x5c   : > { %v239_v24 = vmax.f32 %v956_v20, 0.008856  ;;  %v961_v25 = vadd.f32 %v268_v15, %v267_v21  ;;  %v299_v33 = vmul.f32 0.87276554, %v940_v0  ;;  %v298_v35 = vadd.f32 %v297_v27, %v296_v26  ;;  %s743_s12 = smov [#allocation7]  }
  0x5d   : > { %v254_v28 = vmax.f32 %v958_v22, 0.008856  ;;  %v965_v29 = vadd.f32 %v283_v19, %v282_v23  ;;  %v313_v36 = vadd.f32 %v312_v31, %v311_v30  ;;  %v314_v37 = vmul.f32 0.87276554, %v944_v3  ;;  %p653_p12 = pnand %p652_p0, %p1061_p3  ;;  %s655_s16 = sshll.u32 %s743_s12, 4  ;;  %s656_s16 = int_to_ptr.vmem [resolvable:$false] %s655_s16 }
  0x5e   : > { %567 = vlog2.f32 %v239_v24  ;;  %v270_v32 = vmax.f32 %v961_v25, 0.008856  ;;  %v972_v38 = vadd.f32 %v299_v33, %v298_v35  ;;  %v246_v62 = vmul.f32 7.787, %v956_v20  ;;  %s657_s20 = scalar_lea.vmem %s656_s16, 256  ;;  %p658_p7 = scmp.lt.s32.totalorder %s996_s18, %s656_s16 }
  0x5f   : > { %569 = vlog2.f32 %v254_v28  ;;  %v285_v34 = vmax.f32 %v965_v29, 0.008856  ;;  %v974_v39 = vadd.f32 %v314_v37, %v313_v36  ;;  %v334_v6 = vsub.f32 %v940_v0, %v944_v3  ;;  %p654_p13 = pneg %p653_p12  ;;  %p659_p10 = scmp.lt.s32.totalorder %s657_s20, %s651_s26 }
  0x60   : > { %571 = vlog2.f32 %v270_v32  ;;  %v301_v40 = vmax.f32 %v972_v38, 0.008856  ;;  %v337_v8 = vmul.f32 0.299, %v336_v57  ;;  %v338_v9 = vmul.f32 0.587, %v335_v56 }
  0x61   : > { %573 = vlog2.f32 %v285_v34  ;;  %v316_v41 = vmax.f32 %v974_v39, 0.008856  ;;  %v261_v1 = vmul.f32 7.787, %v958_v22  ;;  %v277_v4 = vmul.f32 7.787, %v961_v25  ;;  %p660_p9 = por %p659_p10, %p658_p7 }
  0x62   : > { %575 = vlog2.f32 %v301_v40  ;;  %v292_v10 = vmul.f32 7.787, %v965_v29  ;;  %v247_v12 = vadd.f32 0.13793103, %v246_v62  ;;  %v339_v14 = vadd.f32 %v338_v9, %v337_v8 }
  0x63   : > { %577 = vlog2.f32 %v316_v41  ;;  %v340_v15 = vmul.f32 0.114, %v334_v6  ;;  %vm245_vm0 = vcmp.gt.f32.partialorder %v956_v20, 0.008856  ;;  %v262_v0 = vadd.f32 0.13793103, %v261_v1  ;;  %p661_p11 = pnand %p660_p9, %p654_p13 }
  0x64   : > { %vm260_vm1 = vcmp.gt.f32.partialorder %v958_v22, 0.008856  ;;  %v278_v3 = vadd.f32 0.13793103, %v277_v4  ;;  %vm276_vm2 = vcmp.gt.f32.partialorder %v961_v25, 0.008856 }
  0x65   : > { %v293_v17 = vadd.f32 0.13793103, %v292_v10  ;;  %vm291_vm3 = vcmp.gt.f32.partialorder %v965_v29, 0.008856  ;;  %v308_v21 = vmul.f32 7.787, %v972_v38  ;;  %v341_v23 = vadd.f32 %v340_v15, %v339_v14 }
  0x66   : > { %v323_v20 = vmul.f32 7.787, %v974_v39  ;;  %vm307_vm4 = vcmp.gt.f32.partialorder %v972_v38, 0.008856  ;;  %vm322_vm5 = vcmp.gt.f32.partialorder %v974_v39, 0.008856 }
  0x67   : > { %v309_v32 = vadd.f32 0.13793103, %v308_v21  ;;  %v342_v25 = vsub.f32 %v334_v6, %v341_v23  ;;  %v345_v33 = vsub.f32 %v336_v57, %v341_v23 }
  0x68   : > { %v568_v42 = vpop.eup %567  ;;  %v324_v34 = vadd.f32 0.13793103, %v323_v20 }
  0x69   : > { %v570_v43 = vpop.eup %569  ;;  %v241_v44 = vmul.f32 0.6931472, %v568_v42  ;;  %v343_v40 = vand.u32 2147483647, %v342_v25  ;;  %v346_v41 = vand.u32 2147483647, %v345_v33 }
  0x6a   : > { %v572_v45 = vpop.eup %571  ;;  %v256_v46 = vmul.f32 0.6931472, %v570_v43 }
  0x6b   : > { %v574_v47 = vpop.eup %573  ;;  %v242_v48 = vmul.f32 0.33333334, %v241_v44  ;;  %v272_v49 = vmul.f32 0.6931472, %v572_v45 }
  0x6c   : > { %v257_v50 = vmul.f32 0.33333334, %v256_v46  ;;  %v287_v51 = vmul.f32 0.6931472, %v574_v47  ;;  %v576_v59 = vpop.eup %575  ;;  %v344_v46 = vmul.f32 0.492, %v343_v40 }
  0x6d   : > { %v243_v52 = vmul.f32 1.442695, %v242_v48  ;;  %v273_v53 = vmul.f32 0.33333334, %v272_v49  ;;  %v578_v61 = vpop.eup %577  ;;  %v303_v63 = vmul.f32 0.6931472, %v576_v59 }
  0x6e   : > { %v258_v54 = vmul.f32 1.442695, %v257_v50  ;;  %v288_v55 = vmul.f32 0.33333334, %v287_v51  ;;  %v318_v7 = vmul.f32 0.6931472, %v578_v61 }
  0x6f   : > { %579 = vpow2.f32 %v243_v52  ;;  %v274_v58 = vmul.f32 1.442695, %v273_v53  ;;  %v304_v2 = vmul.f32 0.33333334, %v303_v63  ;;  %v347_v47 = vmul.f32 0.877, %v346_v41 }
  0x70   : > { %581 = vpow2.f32 %v258_v54  ;;  %v289_v60 = vmul.f32 1.442695, %v288_v55  ;;  %v319_v5 = vmul.f32 0.33333334, %v318_v7 }
  0x71   : > { %583 = vpow2.f32 %v274_v58  ;;  %v305_v11 = vmul.f32 1.442695, %v304_v2  ;;  %v348_v39 = vadd.f32 %v347_v47, %v344_v46 }
  0x72   : > { %585 = vpow2.f32 %v289_v60  ;;  %v320_v13 = vmul.f32 1.442695, %v319_v5 }
  0x73   : > { %587 = vpow2.f32 %v305_v11 }
  0x74   : > { %589 = vpow2.f32 %v320_v13 }
  0x79   : > { %v580_v16 = vpop.eup %579 }
  0x7a   : > { %v582_v18 = vpop.eup %581  ;;  %v248_v19 = vsel %vm245_vm0, %v580_v16, %v247_v12 }
  0x7b   : > { %v584_v24 = vpop.eup %583  ;;  %v263_v26 = vsel %vm260_vm1, %v582_v18, %v262_v0 }
  0x7c   : > { %v586_v27 = vpop.eup %585  ;;  %v264_v28 = vsub.f32 %v248_v19, %v263_v26  ;;  %v279_v22 = vsel %vm276_vm2, %v584_v24, %v278_v3 }
  0x7d   : > { %v294_v30 = vsel %vm291_vm3, %v586_v27, %v293_v17  ;;  %v588_v35 = vpop.eup %587 }
  0x7e   : > { %v295_v31 = vsub.f32 %v279_v22, %v294_v30  ;;  %v590_v36 = vpop.eup %589  ;;  %v310_v37 = vsel %vm307_vm4, %v588_v35, %v309_v32 }
  0x7f   : > { %v325_v42 = vsel %vm322_vm5, %v590_v36, %v324_v34 }
  0x80   : > { %v327_v29 = vsub.f32 %v264_v28, %v295_v31  ;;  %v326_v43 = vsub.f32 %v310_v37, %v325_v42 }
  0x82   : > { %v328_v44 = vand.u32 2147483647, %v327_v29  ;;  %v330_v45 = vsub.f32 %v295_v31, %v326_v43 }
  0x84   : > { %v329_v38 = vmul.f32 500.0, %v328_v44  ;;  %v331_v48 = vand.u32 2147483647, %v330_v45 }
  0x86   : > { %v332_v49 = vmul.f32 200.0, %v331_v48 }
  0x88   : > { %v333_v50 = vadd.f32 %v332_v49, %v329_v38 }
  0x8a   : > { %v349_v51 = vadd.f32 %v348_v39, %v333_v50 }
  0x8c   : > { %351 = vst [vmem:[%s221_s8] sm:$0xff] %v349_v51 }
  0x8d   : > { %664 = shalt.err (!%p661_p11)
}
  0x8e   : > { %s665_s27 = scalar_lea.hbm %s1001_s4, 128  ;;  %s669_s30 = scalar_lea.hbm %s1050_s2, 256 }
  0x8f   : > { %p666_p1 = scmp.ne.s32.totalorder %s1001_s4, %s665_s27  ;;  %p670_p4 = scmp.lt.u32.totalorder %s1001_s4, %s1050_s2 }
  0x90   : > { %p671_p6 = scmp.lt.u32.totalorder %s669_s30, %s665_s27  ;;  %p673_p0 = scmp.lt.u32.totalorder %s665_s27, %s1001_s4 }
  0x91   : > { %p667_p5 = pnand %p666_p1, %p1061_p3 }
  0x92   : > { %p672_p8 = por %p671_p6, %p670_p4 }
  0x93   : > { %p668_p2 = pneg %p667_p5 }
  0x94   : > { %p674_p12 = por %p673_p0, %p672_p8 }
  0x96   : > { %p675_p13 = pnand %p674_p12, %p668_p2 }
  0x98   : > { %678 = shalt.err (!%p675_p13)
}
  0x99   : > { %502 = dma.vmem_to_hbm [thread:$0]  (%p1061_p3), %s996_s18, 128, %s1001_s4, %s353_s15  }
  0x9a PF: > { %s379_s7 = sand.u32 1, %s717_s9   ;;  %p1062_p7 = scmp.ne.s32.totalorder %s1056_s24, 0 }
  0x9b   : > { %p1063_p10 = scmp.ge.s32.totalorder %s737_s14, 2  ;;  %s380_s21 = scalar_lea.sflag [#allocation4], %s379_s7 }
  0x9d   : > { %p512_p9 = pnand %p1063_p10, %p1062_p7 }
  0x9f   : > { %712 = dma.done.wait (!%p512_p9), %s380_s21, 128  }
  0xa0   : > { %714 = vsyncadd (!%p512_p9), %s380_s21, 4294967168  ;;  %s21_s14 = sadd.s32 1, %s737_s14   ;;  %s1064_s9 = smov %s721_s10 }
  0xa1   : > { %p18_p11 = scmp.ge.s32.totalorder %s21_s14, 4   ;;  %s1065_s10 = smov %s725_s11 }
  0xa2   : > { %s1066_s11 = smov %s815_s23  ;;  %s1067_s12 = smov %s733_s13 }
  0xa3   : > { %s1068_s13 = smov %s1070_s17  ;;  %20 = sbr.rel (!%p18_p11) target bundleno = 8 (0x8), region = 90 }
  0xaa   :  { %385 = vsyncpa [#allocation3], 1 }
  0xab   :  { %387 = vsyncpa [#allocation3 + $0x1], 1 }
  0xac   :  { %388 = vsyncpa [#allocation6], 1 }
  0xad   :  { %390 = vsyncpa [#allocation6 + $0x1], 1 }
  0xae   :  { %391 = vsyncpa [#allocation4], 1 }
  0xaf   :  { %393 = vsyncpa [#allocation4 + $0x1], 1 }

</bundles_post_ra>
